<compile_context>
chip_gen: v7x
topology: tpu7x:2x2x1
jax: 0.10.0
libtpu: 0.0.40
codegen_flags: <defaults>
</compile_context>

<pallas_src>
import jax
import jax.numpy as jnp
import numpy as np
from jax.experimental import pallas as pl
from jax.experimental.pallas import tpu as pltpu


def bits_rep_kernel(n_cols_ref, on_bits_ref, h_ref):
    # n_cols_ref : VMEM (ROWS, 1)         int32
    # on_bits_ref: VMEM (ROWS, K)         int32  (padded with -1)
    # h_ref      : VMEM (ROWS, COL_BLOCK) float32 (dense, lane/sublane aligned)
    rows, col_block = h_ref.shape
    k = on_bits_ref.shape[1]

    # Global column indices for this lane block (>= 0, so -1 sentinel never hits).
    col0 = pl.program_id(1) * col_block
    col = col0 + jax.lax.broadcasted_iota(jnp.int32, (1, col_block), 1)
    colb = jnp.broadcast_to(col, (rows, col_block))  # hoist: broadcast once, not K times

    n_cols = n_cols_ref[...]   # (rows, 1)
    ob = on_bits_ref[...]      # (rows, K)

    # Membership: balanced OR-tree over K broadcast compares (pure VPU work).
    terms = [colb == ob[:, j:j + 1] for j in range(k)]
    while len(terms) > 1:
        nxt = [jnp.logical_or(a, b) for a, b in zip(terms[0::2], terms[1::2])]
        if len(terms) % 2:
            nxt.append(terms[-1])
        terms = nxt
    member = terms[0]

    # on_bits assignment happens AFTER the -1 fill in the reference -> it wins.
    h_ref[...] = jnp.where(
        member,
        jnp.float32(1.0),
        jnp.where(colb < n_cols, jnp.float32(-1.0), jnp.float32(0.0)),
    )


def _pick_rows(batch, col_block):
    """Rows per output block: ~2 MiB/buffer, multiple of 8, >=2 grid steps when possible."""
    target_bytes = 2 << 20
    rows = target_bytes // (col_block * 4)
    rows = int(max(8, min(1024, (rows // 8) * 8)))
    b_pad8 = pl.cdiv(batch, 8) * 8
    rows = min(rows, b_pad8)
    # v7x megacore: keep at least 2 batch grid steps when the batch allows it.
    if b_pad8 > 8 and pl.cdiv(b_pad8, rows) < 2:
        rows = max(8, ((b_pad8 // 2) // 8) * 8)
    return rows


def bits_rep_net_batched(on_bits, n_cols, out_dim, *, force_pallas=False):
    """Batched BitsRepNet forward.

    on_bits: (B, K) int32, per-row on-bit column indices padded with -1.
    n_cols : (B,)   int32, per-row number of represented columns.
    Returns (B, out_dim) float32.
    """
    on_bits = jnp.asarray(on_bits, jnp.int32)
    if on_bits.ndim == 1:
        on_bits = on_bits[None, :]
    n_cols = jnp.asarray(n_cols, jnp.int32)
    B, K = on_bits.shape
    n_cols = n_cols.reshape(B)

    # Lane tiling: chunk out_dim into lane-dense blocks of <= 4096 (multiple of 128).
    col_block = min(4096, pl.cdiv(out_dim, 128) * 128)
    out_pad = pl.cdiv(out_dim, col_block) * col_block

    # Fast path: tiny problems are pure launch/padding overhead in Pallas; let XLA fuse.
    if not force_pallas and B * out_pad < 64 * 1024:
        col = jnp.arange(out_dim, dtype=jnp.int32)[None, :]
        member = jnp.any(on_bits[:, :, None] == col[:, None, :], axis=1)
        base = jnp.where(col < n_cols[:, None], -1.0, 0.0).astype(jnp.float32)
        return jnp.where(member, jnp.float32(1.0), base)

    # Pad batch to a multiple of the row block (padded rows: n_cols=0 / on_bits=-1 -> 0.0).
    rows = _pick_rows(B, col_block)
    b_pad = pl.cdiv(B, rows) * rows
    if b_pad != B:
        on_bits = jnp.concatenate(
            [on_bits, jnp.full((b_pad - B, K), -1, jnp.int32)], axis=0)
        n_cols = jnp.concatenate(
            [n_cols, jnp.zeros((b_pad - B,), jnp.int32)], axis=0)
    n_cols2 = n_cols.reshape(b_pad, 1)

    grid = (b_pad // rows, out_pad // col_block)

    h = pl.pallas_call(
        bits_rep_kernel,
        out_shape=jax.ShapeDtypeStruct((b_pad, out_pad), jnp.float32),
        grid=grid,
        in_specs=[
            pl.BlockSpec((rows, 1), lambda i, j: (i, 0)),
            pl.BlockSpec((rows, K), lambda i, j: (i, 0)),
        ],
        out_specs=pl.BlockSpec((rows, col_block), lambda i, j: (i, j)),
        compiler_params=pltpu.CompilerParams(
            dimension_semantics=("parallel", "parallel"),
        ),
    )(n_cols2, on_bits)

    return h[:B, :out_dim]


def bits_rep_net(on_bits, n_cols, out_dim):
    """Single-row API mirroring BitsRepNet.forward -> (h, h), h: (1, out_dim)."""
    on_bits = jnp.asarray(on_bits, jnp.int32).reshape(1, -1)
    n_cols = jnp.asarray(n_cols, jnp.int32).reshape(1)
    h = bits_rep_net_batched(on_bits, n_cols, out_dim)
    return h, h


if __name__ == "__main__":
    # Config consistent with the module: bits_compress=16, embed_dim (out_dim)=32.
    bits_compress = 16
    out_dim = 32
    B = 128   # batch of independent BitsRepNet rows
    K = 8     # max on-bits per row, padded with -1

    key = jax.random.PRNGKey(0)
    k1, k2 = jax.random.split(key)
    # Per-row number of represented columns in [1, bits_compress].
    n_cols = jax.random.randint(k1, (B,), 1, bits_compress + 1).astype(jnp.int32)
    # Per-row candidate on-bit indices; keep those < n_cols[b], pad rest with -1.
    cand = jax.random.randint(k2, (B, K), 0, bits_compress).astype(jnp.int32)
    on_bits = jnp.where(cand < n_cols[:, None], cand, jnp.int32(-1))

    # Pallas path (forced; auto-dispatch would route this small problem to XLA).
    h = bits_rep_net_batched(on_bits, n_cols, out_dim, force_pallas=True)
    jax.block_until_ready(h)

    # Reference (mirrors the PyTorch forward, row by row).
    ref = np.zeros((B, out_dim), np.float32)
    nb = np.asarray(n_cols)
    ob = np.asarray(on_bits)
    for b in range(B):
        ref[b, :nb[b]] = -1.0
        for idx in ob[b]:
            if idx >= 0:
                ref[b, idx] = 1.0
    assert np.array_equal(np.asarray(h), ref)

    # XLA fast path and single-row module API (returns (h, h)).
    h_fast = bits_rep_net_batched(on_bits, n_cols, out_dim)
    jax.block_until_ready(h_fast)
    assert np.array_equal(np.asarray(h_fast), ref)

    h1, h2 = bits_rep_net(on_bits[0], n_cols[0], out_dim)
    jax.block_until_ready(h1)
    assert np.array_equal(np.asarray(h1), ref[0:1])
    assert np.array_equal(np.asarray(h2), ref[0:1])

    print("KERNEL_OK")
</pallas_src>

<mosaic_0001>
module attributes {stable_mosaic.version = 11 : i64} {
  func.func @bits_rep_kernel(%arg0: i32, %arg1: i32, %arg2: memref<64x1xi32, #tpu.memory_space<vmem>>, %arg3: memref<64x8xi32, #tpu.memory_space<vmem>>, %arg4: memref<64x128xf32, #tpu.memory_space<vmem>>) attributes {dimension_semantics = [#tpu.dimension_semantics<parallel>, #tpu.dimension_semantics<parallel>], iteration_bounds = array<i64: 2, 1>, scalar_prefetch = 0 : i64, scratch_operands = 0 : i64, tpu.core_type = #tpu.core_type<tc>, window_params = [{transform_indices = @transform_0, window_bounds = array<i64: 64, 1>}, {transform_indices = @transform_1, window_bounds = array<i64: 64, 8>}, {transform_indices = @transform_2, window_bounds = array<i64: 64, 128>}]} {
    %c128_i32 = arith.constant 128 : i32
    %0 = arith.muli %arg1, %c128_i32 : i32
    %1 = tpu.iota {dimensions = array<i32: 1>} : vector<1x128xi32>
    %2 = vector.broadcast %0 : i32 to vector<1x128xi32>
    %3 = arith.addi %2, %1 : vector<1x128xi32>
    %4 = vector.shape_cast %3 : vector<1x128xi32> to vector<1x128xi32>
    %5 = vector.broadcast %4 : vector<1x128xi32> to vector<64x128xi32>
    %c0 = arith.constant 0 : index
    %c0_0 = arith.constant 0 : index
    %6 = vector.load %arg2[%c0, %c0_0] : memref<64x1xi32, #tpu.memory_space<vmem>>, vector<64x1xi32>
    %c0_1 = arith.constant 0 : index
    %c0_2 = arith.constant 0 : index
    %7 = vector.load %arg3[%c0_1, %c0_2] : memref<64x8xi32, #tpu.memory_space<vmem>>, vector<64x8xi32>
    %8 = vector.extract_strided_slice %7 {offsets = [0, 0], sizes = [64, 1], strides = [1, 1]} : vector<64x8xi32> to vector<64x1xi32>
    %9 = vector.broadcast %8 : vector<64x1xi32> to vector<64x128xi32>
    %10 = arith.cmpi eq, %5, %9 : vector<64x128xi32>
    %11 = vector.extract_strided_slice %7 {offsets = [0, 1], sizes = [64, 1], strides = [1, 1]} : vector<64x8xi32> to vector<64x1xi32>
    %12 = vector.broadcast %11 : vector<64x1xi32> to vector<64x128xi32>
    %13 = arith.cmpi eq, %5, %12 : vector<64x128xi32>
    %14 = vector.extract_strided_slice %7 {offsets = [0, 2], sizes = [64, 1], strides = [1, 1]} : vector<64x8xi32> to vector<64x1xi32>
    %15 = vector.broadcast %14 : vector<64x1xi32> to vector<64x128xi32>
    %16 = arith.cmpi eq, %5, %15 : vector<64x128xi32>
    %17 = vector.extract_strided_slice %7 {offsets = [0, 3], sizes = [64, 1], strides = [1, 1]} : vector<64x8xi32> to vector<64x1xi32>
    %18 = vector.broadcast %17 : vector<64x1xi32> to vector<64x128xi32>
    %19 = arith.cmpi eq, %5, %18 : vector<64x128xi32>
    %20 = vector.extract_strided_slice %7 {offsets = [0, 4], sizes = [64, 1], strides = [1, 1]} : vector<64x8xi32> to vector<64x1xi32>
    %21 = vector.broadcast %20 : vector<64x1xi32> to vector<64x128xi32>
    %22 = arith.cmpi eq, %5, %21 : vector<64x128xi32>
    %23 = vector.extract_strided_slice %7 {offsets = [0, 5], sizes = [64, 1], strides = [1, 1]} : vector<64x8xi32> to vector<64x1xi32>
    %24 = vector.broadcast %23 : vector<64x1xi32> to vector<64x128xi32>
    %25 = arith.cmpi eq, %5, %24 : vector<64x128xi32>
    %26 = vector.extract_strided_slice %7 {offsets = [0, 6], sizes = [64, 1], strides = [1, 1]} : vector<64x8xi32> to vector<64x1xi32>
    %27 = vector.broadcast %26 : vector<64x1xi32> to vector<64x128xi32>
    %28 = arith.cmpi eq, %5, %27 : vector<64x128xi32>
    %29 = vector.extract_strided_slice %7 {offsets = [0, 7], sizes = [64, 1], strides = [1, 1]} : vector<64x8xi32> to vector<64x1xi32>
    %30 = vector.broadcast %29 : vector<64x1xi32> to vector<64x128xi32>
    %31 = arith.cmpi eq, %5, %30 : vector<64x128xi32>
    %32 = arith.ori %10, %13 : vector<64x128xi1>
    %33 = arith.ori %16, %19 : vector<64x128xi1>
    %34 = arith.ori %22, %25 : vector<64x128xi1>
    %35 = arith.ori %28, %31 : vector<64x128xi1>
    %36 = arith.ori %32, %33 : vector<64x128xi1>
    %37 = arith.ori %34, %35 : vector<64x128xi1>
    %38 = arith.ori %36, %37 : vector<64x128xi1>
    %39 = vector.broadcast %6 : vector<64x1xi32> to vector<64x128xi32>
    %40 = arith.cmpi slt, %5, %39 : vector<64x128xi32>
    %cst = arith.constant -1.000000e+00 : f32
    %cst_3 = arith.constant 0.000000e+00 : f32
    %41 = vector.broadcast %cst : f32 to vector<64x128xf32>
    %42 = vector.broadcast %cst_3 : f32 to vector<64x128xf32>
    %43 = arith.select %40, %41, %42 : vector<64x128xi1>, vector<64x128xf32>
    %cst_4 = arith.constant 1.000000e+00 : f32
    %44 = vector.broadcast %cst_4 : f32 to vector<64x128xf32>
    %45 = arith.select %38, %44, %43 : vector<64x128xi1>, vector<64x128xf32>
    %c0_5 = arith.constant 0 : index
    %c0_6 = arith.constant 0 : index
    %46 = vector.load %arg4[%c0_5, %c0_6] : memref<64x128xf32, #tpu.memory_space<vmem>>, vector<64x128xf32>
    tpu.vector_store %arg4[%c0_5, %c0_6], %45 {strides = array<i32>} : memref<64x128xf32, #tpu.memory_space<vmem>>, vector<64x128xf32>,
    return
  }
  func.func @transform_0(%arg0: i32, %arg1: i32) -> (i32, i32) {
    %c0_i32 = arith.constant 0 : i32
    %c0_i32_0 = arith.constant 0 : i32
    return %arg0, %c0_i32 : i32, i32
  }
  func.func @transform_1(%arg0: i32, %arg1: i32) -> (i32, i32) {
    %c0_i32 = arith.constant 0 : i32
    %c0_i32_0 = arith.constant 0 : i32
    return %arg0, %c0_i32 : i32, i32
  }
  func.func @transform_2(%arg0: i32, %arg1: i32) -> (i32, i32) {
    %c0_i32 = arith.constant 0 : i32
    return %arg0, %arg1 : i32, i32
  }
}

</mosaic_0001>

<bundles_post_ra>
// kernel: tpu_custom_call.1
= control target key start
LH: loop header
LB: loop body
LE: loop exit
PB: predicated region body
PF: predicated region fallthrough
CT: control target
= control target key end

     0   :  { %7 = vsyncpa [#allocation3], 0  ;;  %s1416_s0 = inlined_call_operand.vmem [shape: s32[128,1], index: 0, kind: input, shape index: {}]   ;;  %s1417_s1 = inlined_call_operand.vmem [shape: s32[128,8], index: 1, kind: input, shape index: {}]   ;;  %s1418_s2 = inlined_call_operand.hbm [shape: f32[128,128], index: 2, kind: output, shape index: {}]  }
   0x1   :  { %9 = vsyncpa [#allocation3 + $0x1], 0  ;;  %s875_s9 = smov 0   ;;  %s877_s10 = smov 0  }
   0x2   :  { %s879_s11 = smov 0   ;;  %s881_s12 = smov 0  }
   0x3   :  { %s883_s13 = smov 0   ;;  %s885_s14 = smov 0  }
   0x4 LB: > { %s669_s15 = sadd.s32 4294967295, %s846_s14   ;;  %s670_s16 = sadd.s32 4294967294, %s846_s14   ;;  %s846_s14 = sphi %s885_s14, %s15_s14   ;;  %s842_s13 = sphi %s883_s13, %s1514_s13   ;;  %s838_s12 = sphi %s881_s12, %s1513_s12   ;;  %s834_s11 = sphi %s879_s11, %s1512_s11   ;;  %s830_s10 = sphi %s877_s10, %s1511_s10   ;;  %s826_s9 = sphi %s875_s9, %s1510_s9  }
   0x5   : > { %s27_s17 = sadd.s32 1, %s842_s13  ;;  %s88_s18 = sadd.s32 1, %s834_s11 }
   0x6   : > { %p29_p0 = scmp.ge.s32.totalorder %s27_s17, 2  ;;  %p98_p1 = scmp.ne.s32.totalorder %s834_s11, %s830_s10 }
   0x7   : > { %p99_p2 = scmp.eq.s32.totalorder %s669_s15, 1  ;;  %p104_p3 = scmp.ne.s32.totalorder %s830_s10, %s826_s9 }
   0x8   : > { %s1516_s17 = smov (%p29_p0, %s27_s17), 0  ;;  %p105_p5 = scmp.eq.s32.totalorder %s670_s16, 1 }
   0x9   : > { %p915_p4 = por %p99_p2, %p98_p1  ;;  %s83_s20 = ssub.s32 %s842_s13, %s1516_s17 }
   0xa   : > { %p673_p6 = scmp.ge.s32.totalorder %s846_s14, 1  ;;  %p86_p7 = scmp.eq.s32.totalorder %s83_s20, 0 }
   0xb   : > { %p922_p8 = por %p105_p5, %p104_p3  ;;  %p141_p9 = scmp.lt.s32.totalorder %s846_s14, 3 }
   0xc   : > { %s928_s22 = scalar_select %p86_p7, %s834_s11, %s88_s18  }
   0xd   : > { %p142_p10 = pnand %p673_p6, %p141_p9 }
   0xe   : > { %s675_s23 = sshll.u32 (!%p142_p10), %s838_s12, 3  ;;  %v848_v0 = vmov (!%p142_p10), 1   ;;  %v849_v1 = vmov (!%p142_p10), 0   ;;  %v850_v8 = vmov (!%p142_p10), 2   ;;  %v851_v11 = vmov (!%p142_p10), 3   ;;  %s165_s3 = sand.u32 (!%p142_p10), 1, %s830_s10  }
   0xf   : > { %145 = sbr.rel (%p142_p10) target bundleno = 336 (0x150), region = 28  ;;  %752 = vset.pattern.permute.xlu0 (!%p142_p10), %v848_v0  ;;  %751 = vset.pattern.permute.xlu1 (!%p142_p10), %v849_v1  ;;  %p169_p11 = scmp.lt.s32.totalorder (!%p142_p10), %s675_s23, 15  ;;  %v852_v12 = vmov (!%p142_p10), 4   ;;  %v853_v13 = vmov (!%p142_p10), 5   ;;  %v854_v14 = vmov (!%p142_p10), 6   ;;  %v855_v15 = vmov (!%p142_p10), 7  }
  0x10   : > { %v182_v18 = vlaneseq (!%p142_p10)  ;;  %v1435_v25 = vmov (!%p142_p10), 0  ;;  %v1437_v28 = vmov (!%p142_p10), 0  ;;  %v1439_v31 = vmov (!%p142_p10), 0  ;;  %s674_s4 = sshll.u32 (!%p142_p10), %s165_s3, 6  ;;  %s684_s6 = sshll.u32 (!%p142_p10), %s838_s12, 10 }
  0x11   : > { %v1441_v38 = vmov (!%p142_p10), 0  ;;  %v1445_v53 = vmov (!%p142_p10), 0  ;;  %v1447_v56 = vmov (!%p142_p10), 0  ;;  %v1449_v59 = vmov (!%p142_p10), 0  ;;  %s1294_s5 = scalar_lea.vmem (!%p142_p10), [#allocation2], %s674_s4  ;;  %s1360_s16 = scalar_lea.hbm (!%p142_p10), %s1418_s2, %s684_s6 }
  0x12   : > { %v1029_v22 = vand.u32 (!%p142_p10), 127, %v182_v18  ;;  %v1451_v62 = vmov (!%p142_p10), 0  ;;  %v1480_v48 = vmov (!%p142_p10), 0  ;;  %s585_s7 = sshll.u32 (!%p142_p10), %s1294_s5, 4  ;;  %s1370_s12 = scalar_lea.sflag (!%p142_p10), [#allocation3], %s165_s3  ;;  %s1362_s7 = int_to_ptr.vmem [resolvable:$true] %s585_s7 }
  0x13   : > { %s768_s18 = scalar_lea.vmem (!%p142_p10), %s1362_s7, 1024  ;;  %s857_s20 = smov (!%p142_p10), [#allocation2]  }
  0x14   : > { %p769_p12 = scmp.ne.s32.totalorder (!%p142_p10), %s1362_s7, %s768_s18 }
  0x16   : > { %s1518_s23 = smov (!%p169_p11, %s675_s23), 15  ;;  %p770_p13 = pnand %p769_p12, %p915_p4 }
  0x17   : > { %s676_s24 = sshll.u32 %s1518_s23, 3  ;;  %s772_s23 = sshll.u32 %s857_s20, 4  ;;  %s773_s23 = int_to_ptr.vmem [resolvable:$false] %s772_s23 }
  0x18   : > { %s178_s27 = scalar_lea.vmem %s1417_s1, %s676_s24  ;;  %s1018_s30 = scalar_lea.vmem %s1416_s0, %s676_s24 }
  0x19   : > { %v940_v2 = vld [vmem:[%s178_s27 + $0x10] sm:$0xff]  ;;  %v942_v3 = vld [vmem:[%s178_s27] sm:$0xff]  ;;  %v946_v4 = vld [vmem:[%s178_s27 + $0x18] sm:$0xff]  ;;  %p771_p0 = pneg %p770_p13  ;;  %s774_s24 = scalar_lea.vmem %s773_s23, 2048 }
  0x1a   : > { %209 = vperm.xlu1 %751, %v940_v2   ;;  %235 = vperm.xlu0 %752, %v942_v3   ;;  %v950_v5 = vld [vmem:[%s178_s27 + $0x28] sm:$0xff]  ;;  %v954_v6 = vld [vmem:[%s178_s27 + $0x38] sm:$0xff]  ;;  %v962_v9 = vld [vmem:[%s178_s27 + $0x20] sm:$0xff]  ;;  %p775_p1 = scmp.lt.s32.totalorder %s1362_s7, %s773_s23  ;;  %p776_p2 = scmp.lt.s32.totalorder %s774_s24, %s768_s18 }
  0x1b   : > { %v958_v7 = vld [vmem:[%s178_s27 + $0x8] sm:$0xff]  ;;  %v966_v10 = vld [vmem:[%s178_s27 + $0x30] sm:$0xff]  ;;  %v190_v17 = vld [vmem:[%s1018_s30 + $0x20] sm:$0xff] }
  0x1c   : > { %v187_v16 = vld [vmem:[%s1018_s30 + $0x8] sm:$0xff]  ;;  %v192_v21 = vld [vmem:[%s1018_s30 + $0x30] sm:$0xff]  ;;  %v186_v34 = vld [vmem:[%s1018_s30] sm:$0xff]  ;;  %p777_p3 = por %p776_p2, %p775_p1 }
  0x1d   : > { %v188_v37 = vld [vmem:[%s1018_s30 + $0x10] sm:$0xff]  ;;  %v189_v41 = vld [vmem:[%s1018_s30 + $0x18] sm:$0xff]  ;;  %v191_v43 = vld [vmem:[%s1018_s30 + $0x28] sm:$0xff] }
  0x1e   : > { %212 = vperm.xlu1 %751, %v946_v4   ;;  %244 = vperm.xlu0 %752, %v946_v4   ;;  %v193_v46 = vld [vmem:[%s1018_s30 + $0x38] sm:$0xff]  ;;  %p778_p5 = pnand %p777_p3, %p771_p0 }
  0x22   : > { %218 = vperm.xlu1 %751, %v950_v5   ;;  %250 = vperm.xlu0 %752, %v950_v5  }
  0x26   : > { %224 = vperm.xlu1 %751, %v954_v6   ;;  %256 = vperm.xlu0 %752, %v954_v6  }
  0x2a   : > { %753 = vset.pattern.permute.xlu1 %v848_v0  ;;  %755 = vset.pattern.permute.xlu0 %v850_v8 }
  0x2b   : > { %238 = vperm.xlu1 %753, %v958_v7   ;;  %270 = vperm.xlu0 %755, %v958_v7  }
  0x2f   : > { %241 = vperm.xlu1 %753, %v940_v2   ;;  %279 = vperm.xlu0 %755, %v962_v9  }
  0x33   : > { %247 = vperm.xlu1 %753, %v962_v9   ;;  %285 = vperm.xlu0 %755, %v966_v10  }
  0x37   : > { %253 = vperm.xlu1 %753, %v966_v10   ;;  %756 = vset.pattern.permute.xlu0 %v851_v11 }
  0x38   : > { %299 = vperm.xlu0 %756, %v942_v3  }
  0x3b   : > { %754 = vset.pattern.permute.xlu1 %v850_v8 }
  0x3c   : > { %267 = vperm.xlu1 %754, %v942_v3   ;;  %308 = vperm.xlu0 %756, %v946_v4  }
  0x40   : > { %273 = vperm.xlu1 %754, %v940_v2   ;;  %314 = vperm.xlu0 %756, %v950_v5  }
  0x44   : > { %276 = vperm.xlu1 %754, %v946_v4   ;;  %320 = vperm.xlu0 %756, %v954_v6  }
  0x48   : > { %282 = vperm.xlu1 %754, %v950_v5   ;;  %759 = vset.pattern.permute.xlu0 %v852_v12 }
  0x49   : > { %334 = vperm.xlu0 %759, %v958_v7  }
  0x4c   : > { %288 = vperm.xlu1 %754, %v954_v6  }
  0x4d   : > { %343 = vperm.xlu0 %759, %v962_v9  }
  0x50   : > { %757 = vset.pattern.permute.xlu1 %v851_v11 }
  0x51   : > { %302 = vperm.xlu1 %757, %v958_v7   ;;  %349 = vperm.xlu0 %759, %v966_v10  }
  0x55   : > { %305 = vperm.xlu1 %757, %v940_v2   ;;  %760 = vset.pattern.permute.xlu0 %v853_v13 }
  0x56   : > { %363 = vperm.xlu0 %760, %v942_v3  }
  0x59   : > { %311 = vperm.xlu1 %757, %v962_v9  }
  0x5a   : > { %372 = vperm.xlu0 %760, %v946_v4  }
  0x5d   : > { %317 = vperm.xlu1 %757, %v966_v10  }
  0x5e   : > { %378 = vperm.xlu0 %760, %v950_v5  }
  0x61   : > { %758 = vset.pattern.permute.xlu1 %v852_v12 }
  0x62   : > { %331 = vperm.xlu1 %758, %v942_v3   ;;  %384 = vperm.xlu0 %760, %v954_v6  }
  0x66   : > { %337 = vperm.xlu1 %758, %v940_v2   ;;  %763 = vset.pattern.permute.xlu0 %v854_v14 }
  0x67   : > { %398 = vperm.xlu0 %763, %v958_v7  }
  0x6a   : > { %340 = vperm.xlu1 %758, %v946_v4  }
  0x6b   : > { %407 = vperm.xlu0 %763, %v962_v9  }
  0x6e   : > { %346 = vperm.xlu1 %758, %v950_v5  }
  0x6f   : > { %413 = vperm.xlu0 %763, %v966_v10  }
  0x72   : > { %352 = vperm.xlu1 %758, %v954_v6  }
  0x73   : > { %764 = vset.pattern.permute.xlu0 %v855_v15 }
  0x74   : > { %427 = vperm.xlu0 %764, %v942_v3  }
  0x76   : > { %761 = vset.pattern.permute.xlu1 %v853_v13 }
  0x77   : > { %366 = vperm.xlu1 %761, %v958_v7  }
  0x78   : > { %436 = vperm.xlu0 %764, %v946_v4  }
  0x7b   : > { %369 = vperm.xlu1 %761, %v940_v2  }
  0x7c   : > { %442 = vperm.xlu0 %764, %v950_v5  }
  0x7f   : > { %375 = vperm.xlu1 %761, %v962_v9  }
  0x80   : > { %448 = vperm.xlu0 %764, %v954_v6  }
  0x83   : > { %381 = vperm.xlu1 %761, %v966_v10  }
  0x84   : > { %766 = vset.pattern.permute.xlu0 %v849_v1 }
  0x85   : > { %203 = vperm.xlu0 %766, %v942_v3  }
  0x87   : > { %762 = vset.pattern.permute.xlu1 %v854_v14 }
  0x88   : > { %395 = vperm.xlu1 %762, %v942_v3  }
  0x89   : > { %206 = vperm.xlu0 %766, %v958_v7  }
  0x8c   : > { %401 = vperm.xlu1 %762, %v940_v2  }
  0x8d   : > { %215 = vperm.xlu0 %766, %v962_v9  }
  0x90   : > { %404 = vperm.xlu1 %762, %v946_v4   ;;  %v1455_v4 = vmov 0 }
  0x91   : > { %221 = vperm.xlu0 %766, %v966_v10  }
  0x94   : > { %410 = vperm.xlu1 %762, %v950_v5  }
  0x95   : > { %518 = vperm.xlu0 %766, %v187_v16  }
  0x98   : > { %416 = vperm.xlu1 %762, %v954_v6  }
  0x99   : > { %v210_v19 = vpop.permute.xlu1 %209  ;;  %v1026_v20 = vpop.permute.xlu0 %235  ;;  %527 = vperm.xlu0 %766, %v190_v17  }
  0x9a   : > { %vm228_vm9 = vcmp.eq.s32.totalorder %v1029_v22, %v210_v19 }
  0x9c   : > { %765 = vset.pattern.permute.xlu1 %v855_v15 }
  0x9d   : > { %v213_v23 = vpop.permute.xlu1 %212  ;;  %430 = vperm.xlu1 %765, %v958_v7   ;;  %v245_v24 = vpop.permute.xlu0 %244  ;;  %533 = vperm.xlu0 %766, %v192_v21   ;;  %v1457_v7 = vmov 0  ;;  %v1465_v21 = vmov 0 }
  0x9e   : > { %vm229_vm0 = vcmp.eq.s32.totalorder %v1029_v22, %v213_v23  ;;  %vm261_vm1 = vcmp.eq.s32.totalorder %v1029_v22, %v245_v24 }
  0x9f   : > { %vm1034_vm2 = vmor %vm229_vm0, %vm261_vm1 }
  0xa0   : > { %v1436_v25 = vsel %vm1034_vm2, 4294967295, %v1435_v25 }
  0xa1   : > { %v219_v26 = vpop.permute.xlu1 %218  ;;  %433 = vperm.xlu1 %765, %v940_v2   ;;  %v251_v27 = vpop.permute.xlu0 %250 }
  0xa2   : > { %vm231_vm3 = vcmp.eq.s32.totalorder %v1029_v22, %v219_v26  ;;  %vm263_vm4 = vcmp.eq.s32.totalorder %v1029_v22, %v251_v27 }
  0xa3   : > { %vm1041_vm5 = vmor %vm231_vm3, %vm263_vm4 }
  0xa4   : > { %v1438_v28 = vsel %vm1041_vm5, 4294967295, %v1437_v28 }
  0xa5   : > { %v225_v29 = vpop.permute.xlu1 %224  ;;  %439 = vperm.xlu1 %765, %v962_v9   ;;  %v257_v30 = vpop.permute.xlu0 %256 }
  0xa6   : > { %vm233_vm6 = vcmp.eq.s32.totalorder %v1029_v22, %v225_v29  ;;  %vm265_vm7 = vcmp.eq.s32.totalorder %v1029_v22, %v257_v30 }
  0xa7   : > { %vm1048_vm8 = vmor %vm233_vm6, %vm265_vm7 }
  0xa8   : > { %v1440_v31 = vsel %vm1048_vm8, 4294967295, %v1439_v31 }
  0xa9   : > { %445 = vperm.xlu1 %765, %v966_v10  }
  0xaa   : > { %v1053_v32 = vpop.permute.xlu1 %238  ;;  %v271_v33 = vpop.permute.xlu0 %270 }
  0xab   : > { %vm259_vm2 = vcmp.eq.s32.totalorder %v1029_v22, %v1053_v32  ;;  %v1471_v32 = vmov 0 }
  0xad   : > { %767 = vset.pattern.permute.xlu1 %v849_v1  ;;  %v1453_v1 = vmov 0 }
  0xae   : > { %v242_v35 = vpop.permute.xlu1 %241  ;;  %515 = vperm.xlu1 %767, %v186_v34   ;;  %v280_v36 = vpop.permute.xlu0 %279 }
  0xaf   : > { %vm260_vm10 = vcmp.eq.s32.totalorder %v1029_v22, %v242_v35 }
  0xb0   : > { %vm1060_vm11 = vmor %vm228_vm9, %vm260_vm10 }
  0xb1   : > { %v1442_v38 = vsel %vm1060_vm11, 4294967295, %v1441_v38 }
  0xb2   : > { %v1064_v39 = vpop.permute.xlu1 %247  ;;  %521 = vperm.xlu1 %767, %v188_v37   ;;  %v286_v40 = vpop.permute.xlu0 %285 }
  0xb6   : > { %v1067_v42 = vpop.permute.xlu1 %253  ;;  %524 = vperm.xlu1 %767, %v189_v41  }
  0xb7   : > { %v300_v44 = vpop.permute.xlu0 %299 }
  0xb8   : > { %vm322_vm12 = vcmp.eq.s32.totalorder %v1029_v22, %v300_v44  ;;  %v1473_v44 = vmov 0 }
  0xba   : > { %530 = vperm.xlu1 %767, %v191_v43  }
  0xbb   : > { %v268_v45 = vpop.permute.xlu1 %267  ;;  %v309_v47 = vpop.permute.xlu0 %308 }
  0xbc   : > { %vm290_vm13 = vcmp.eq.s32.totalorder %v1029_v22, %v268_v45  ;;  %vm325_vm15 = vcmp.eq.s32.totalorder %v1029_v22, %v309_v47 }
  0xbd   : > { %vm1073_vm14 = vmor %vm290_vm13, %vm322_vm12 }
  0xbe   : > { %536 = vperm.xlu1 %767, %v193_v46   ;;  %v1475_v46 = vmov 0 }
  0xbf   : > { %v274_v49 = vpop.permute.xlu1 %273  ;;  %v315_v50 = vpop.permute.xlu0 %314 }
  0xc0   : > { %vm327_vm4 = vcmp.eq.s32.totalorder %v1029_v22, %v315_v50 }
  0xc3   : > { %v277_v51 = vpop.permute.xlu1 %276  ;;  %v321_v52 = vpop.permute.xlu0 %320 }
  0xc4   : > { %vm293_vm0 = vcmp.eq.s32.totalorder %v1029_v22, %v277_v51  ;;  %vm329_vm10 = vcmp.eq.s32.totalorder %v1029_v22, %v321_v52 }
  0xc5   : > { %vm1079_vm1 = vmor %vm293_vm0, %vm325_vm15  ;;  %vm291_vm0 = vcmp.eq.s32.totalorder %v1029_v22, %v271_v33 }
  0xc6   : > { %v1446_v53 = vsel %vm1079_vm1, 4294967295, %v1445_v53 }
  0xc7   : > { %v283_v54 = vpop.permute.xlu1 %282 }
  0xc8   : > { %vm295_vm6 = vcmp.eq.s32.totalorder %v1029_v22, %v283_v54  ;;  %v1089_v55 = vpop.permute.xlu0 %334 }
  0xc9   : > { %vm1091_vm7 = vmor %vm295_vm6, %vm327_vm4 }
  0xca   : > { %v1448_v56 = vsel %vm1091_vm7, 4294967295, %v1447_v56 }
  0xcb   : > { %v289_v57 = vpop.permute.xlu1 %288 }
  0xcc   : > { %vm297_vm12 = vcmp.eq.s32.totalorder %v1029_v22, %v289_v57  ;;  %v1101_v58 = vpop.permute.xlu0 %343 }
  0xcd   : > { %vm1103_vm13 = vmor %vm297_vm12, %vm329_vm10  ;;  %vm292_vm10 = vcmp.eq.s32.totalorder %v1029_v22, %v274_v49 }
  0xce   : > { %v1450_v59 = vsel %vm1103_vm13, 4294967295, %v1449_v59 }
  0xd0   : > { %v303_v60 = vpop.permute.xlu1 %302  ;;  %v1111_v61 = vpop.permute.xlu0 %349 }
  0xd1   : > { %vm323_vm4 = vcmp.eq.s32.totalorder %v1029_v22, %v303_v60 }
  0xd2   : > { %vm1115_vm6 = vmor %vm291_vm0, %vm323_vm4  ;;  %vm294_vm0 = vcmp.eq.s32.totalorder %v1029_v22, %v280_v36 }
  0xd3   : > { %v1452_v62 = vsel %vm1115_vm6, 4294967295, %v1451_v62 }
  0xd4   : > { %v306_v63 = vpop.permute.xlu1 %305 }
  0xd5   : > { %vm324_vm12 = vcmp.eq.s32.totalorder %v1029_v22, %v306_v63  ;;  %v364_v0 = vpop.permute.xlu0 %363 }
  0xd6   : > { %vm1121_vm9 = vmor %vm292_vm10, %vm324_vm12  ;;  %vm296_vm10 = vcmp.eq.s32.totalorder %v1029_v22, %v286_v40  ;;  %vm386_vm15 = vcmp.eq.s32.totalorder %v1029_v22, %v364_v0 }
  0xd7   : > { %v1454_v1 = vsel %vm1121_vm9, 4294967295, %v1453_v1 }
  0xd8   : > { %v312_v2 = vpop.permute.xlu1 %311 }
  0xd9   : > { %vm326_vm4 = vcmp.eq.s32.totalorder %v1029_v22, %v312_v2  ;;  %v373_v3 = vpop.permute.xlu0 %372 }
  0xda   : > { %vm1131_vm3 = vmor %vm294_vm0, %vm326_vm4  ;;  %vm389_vm4 = vcmp.eq.s32.totalorder %v1029_v22, %v373_v3 }
  0xdb   : > { %v1456_v4 = vsel %vm1131_vm3, 4294967295, %v1455_v4 }
  0xdc   : > { %v318_v5 = vpop.permute.xlu1 %317 }
  0xdd   : > { %vm328_vm12 = vcmp.eq.s32.totalorder %v1029_v22, %v318_v5  ;;  %v379_v6 = vpop.permute.xlu0 %378 }
  0xde   : > { %vm1137_vm13 = vmor %vm296_vm10, %vm328_vm12 }
  0xdf   : > { %v1458_v7 = vsel %vm1137_vm13, 4294967295, %v1457_v7 }
  0xe1   : > { %v332_v8 = vpop.permute.xlu1 %331  ;;  %v385_v9 = vpop.permute.xlu0 %384 }
  0xe2   : > { %vm354_vm9 = vcmp.eq.s32.totalorder %v1029_v22, %v332_v8  ;;  %vm393_vm8 = vcmp.eq.s32.totalorder %v1029_v22, %v385_v9 }
  0xe3   : > { %vm1143_vm0 = vmor %vm354_vm9, %vm386_vm15  ;;  %vm391_vm9 = vcmp.eq.s32.totalorder %v1029_v22, %v379_v6 }
  0xe5   : > { %v1147_v11 = vpop.permute.xlu1 %337 }
  0xe6   : > { %v1149_v12 = vpop.permute.xlu0 %398 }
  0xe9   : > { %v341_v13 = vpop.permute.xlu1 %340 }
  0xea   : > { %vm357_vm10 = vcmp.eq.s32.totalorder %v1029_v22, %v341_v13  ;;  %v1153_v14 = vpop.permute.xlu0 %407 }
  0xeb   : > { %vm1155_vm12 = vmor %vm357_vm10, %vm389_vm4  ;;  %vm258_vm10 = vcmp.eq.s32.totalorder %v1029_v22, %v1026_v20  ;;  %v1469_v20 = vmov 0 }
  0xed   : > { %v347_v16 = vpop.permute.xlu1 %346 }
  0xee   : > { %vm359_vm15 = vcmp.eq.s32.totalorder %v1029_v22, %v347_v16  ;;  %v1161_v17 = vpop.permute.xlu0 %413 }
  0xef   : > { %vm1163_vm11 = vmor %vm359_vm15, %vm391_vm9 }
  0xf1   : > { %v353_v19 = vpop.permute.xlu1 %352 }
  0xf2   : > { %vm361_vm7 = vcmp.eq.s32.totalorder %v1029_v22, %v353_v19 }
  0xf3   : > { %vm1169_vm4 = vmor %vm361_vm7, %vm393_vm8  ;;  %v428_v23 = vpop.permute.xlu0 %427 }
  0xf4   : > { %v1466_v21 = vsel %vm1169_vm4, 4294967295, %v1465_v21  ;;  %vm450_vm7 = vcmp.eq.s32.totalorder %v1029_v22, %v428_v23 }
  0xf6   : > { %v367_v24 = vpop.permute.xlu1 %366 }
  0xf7   : > { %v437_v26 = vpop.permute.xlu0 %436 }
  0xfa   : > { %v1173_v27 = vpop.permute.xlu1 %369 }
  0xfb   : > { %v443_v29 = vpop.permute.xlu0 %442 }
  0xfe   : > { %v1175_v30 = vpop.permute.xlu1 %375 }
  0xff   : > { %v449_v33 = vpop.permute.xlu0 %448 }
 0x102   : > { %v1177_v34 = vpop.permute.xlu1 %381 }
 0x104   : > { %v204_v35 = vpop.permute.xlu0 %203 }
 0x105   : > { %vm226_vm8 = vcmp.eq.s32.totalorder %v1029_v22, %v204_v35 }
 0x106   : > { %vm1183_vm9 = vmor %vm226_vm8, %vm258_vm10 }
 0x107   : > { %vm490_vm15 = vmor %vm1183_vm9, %vm1073_vm14  ;;  %v396_v37 = vpop.permute.xlu1 %395 }
 0x108   : > { %vm418_vm4 = vcmp.eq.s32.totalorder %v1029_v22, %v396_v37  ;;  %v207_v40 = vpop.permute.xlu0 %206 }
 0x109   : > { %vm482_vm5 = vmor %vm418_vm4, %vm450_vm7  ;;  %vm227_vm1 = vcmp.eq.s32.totalorder %v1029_v22, %v207_v40  ;;  %vm262_vm4 = vcmp.eq.s32.totalorder %v1029_v22, %v1064_v39 }
 0x10a   : > { %vm498_vm10 = vmor %vm1143_vm0, %vm482_vm5 }
 0x10b   : > { %vm1197_vm8 = vmor %vm227_vm1, %vm259_vm2  ;;  %v402_v41 = vpop.permute.xlu1 %401  ;;  %vm453_vm2 = vcmp.eq.s32.totalorder %v1029_v22, %v437_v26 }
 0x10c   : > { %v1470_v20 = vsel %vm1197_vm8, 4294967295, %v1469_v20  ;;  %v216_v43 = vpop.permute.xlu0 %215  ;;  %vm1208_vm9 = vmor %vm490_vm15, %vm498_vm10  ;;  %vm264_vm10 = vcmp.eq.s32.totalorder %v1029_v22, %v1067_v42 }
 0x10d   : > { %vm230_vm7 = vcmp.eq.s32.totalorder %v1029_v22, %v216_v43  ;;  %v1472_v32 = vsel %vm1208_vm9, 4294967295, %v1471_v32 }
 0x10e   : > { %vm1213_vm5 = vmor %vm230_vm7, %vm262_vm4  ;;  %vm455_vm4 = vcmp.eq.s32.totalorder %v1029_v22, %v443_v29 }
 0x10f   : > { %v1474_v44 = vsel %vm1213_vm5, 4294967295, %v1473_v44  ;;  %v405_v45 = vpop.permute.xlu1 %404  ;;  %vm457_vm5 = vcmp.eq.s32.totalorder %v1029_v22, %v449_v33 }
 0x110   : > { %vm421_vm0 = vcmp.eq.s32.totalorder %v1029_v22, %v405_v45  ;;  %v222_v39 = vpop.permute.xlu0 %221 }
 0x111   : > { %vm485_vm14 = vmor %vm421_vm0, %vm453_vm2  ;;  %vm232_vm15 = vcmp.eq.s32.totalorder %v1029_v22, %v222_v39 }
 0x112   : > { %vm501_vm7 = vmor %vm1155_vm12, %vm485_vm14  ;;  %vm1477_vm12 = vnez %v1436_v25  ;;  %vm1478_vm14 = vnez %v1446_v53  ;;  %v1491_v25 = vmov 0 }
 0x113   : > { %vm1228_vm9 = vmor %vm232_vm15, %vm264_vm10  ;;  %v411_v47 = vpop.permute.xlu1 %410 }
 0x114   : > { %v1476_v46 = vsel %vm1228_vm9, 4294967295, %v1475_v46  ;;  %vm423_vm0 = vcmp.eq.s32.totalorder %v1029_v22, %v411_v47  ;;  %vm1479_vm15 = vmor %vm1477_vm12, %vm1478_vm14  ;;  %v519_v49 = vpop.permute.xlu0 %518  ;;  %vm1487_vm12 = vnez %v1466_v21  ;;  %vm1489_vm9 = vnez %v1450_v59 }
 0x115   : > { %vm487_vm1 = vmor %vm423_vm0, %vm455_vm4  ;;  %vm1482_vm4 = vnez %v1438_v28  ;;  %vm1483_vm0 = vnez %v1448_v56 }
 0x116   : > { %vm503_vm3 = vmor %vm1163_vm11, %vm487_vm1 }
 0x117   : > { %v417_v42 = vpop.permute.xlu1 %416  ;;  %vm1244_vm10 = vmor %vm1479_vm15, %vm501_vm7  ;;  %vm387_vm7 = vcmp.eq.s32.totalorder %v1029_v22, %v367_v24  ;;  %vm539_vm15 = vcmp.lt.s32.totalorder %v1029_v22, %v519_v49 }
 0x118   : > { %v1481_v48 = vsel %vm1244_vm10, 4294967295, %v1480_v48  ;;  %vm425_vm2 = vcmp.eq.s32.totalorder %v1029_v22, %v417_v42  ;;  %vm1484_vm11 = vmor %vm1482_vm4, %vm1483_vm0  ;;  %vm1488_vm10 = vnez %v1440_v31  ;;  %vm388_vm4 = vcmp.eq.s32.totalorder %v1029_v22, %v1173_v27  ;;  %v528_v53 = vpop.permute.xlu0 %527 }
 0x119   : > { %vm1255_vm1 = vmor %vm1484_vm11, %vm503_vm3  ;;  %vm355_vm3 = vcmp.eq.s32.totalorder %v1029_v22, %v1089_v55  ;;  %v856_v31 = vmov 0.0   ;;  %vm1493_vm0 = vnez %v1470_v20  ;;  %vm1494_vm11 = vnez %v1452_v62 }
 0x11a   : > { %vm489_vm13 = vmor %vm425_vm2, %vm457_vm5  ;;  %v547_v51 = vsel %vm539_vm15, -1.0, %v856_v31  ;;  %vm390_vm15 = vcmp.eq.s32.totalorder %v1029_v22, %v1175_v30 }
 0x11b   : > { %vm505_vm14 = vmor %vm1487_vm12, %vm489_vm13  ;;  %vm419_vm13 = vcmp.eq.s32.totalorder %v1029_v22, %v1149_v12 }
 0x11c   : > { %vm1490_vm6 = vmor %vm1488_vm10, %vm1489_vm9  ;;  %v431_v28 = vpop.permute.xlu1 %430  ;;  %vm356_vm10 = vcmp.eq.s32.totalorder %v1029_v22, %v1147_v11 }
 0x11d   : > { %vm1269_vm8 = vmor %vm1490_vm6, %vm505_vm14  ;;  %vm451_vm2 = vcmp.eq.s32.totalorder %v1029_v22, %v431_v28 }
 0x11e   : > { %v1492_v25 = vsel %vm1269_vm8, 4294967295, %v1491_v25  ;;  %vm475_vm5 = vmor %vm355_vm3, %vm387_vm7  ;;  %vm420_vm3 = vcmp.eq.s32.totalorder %v1029_v22, %v402_v41 }
 0x11f   : > { %vm483_vm9 = vmor %vm419_vm13, %vm451_vm2 }
 0x120   : > { %vm499_vm6 = vmor %vm475_vm5, %vm483_vm9  ;;  %v434_v52 = vpop.permute.xlu1 %433  ;;  %vm542_vm9 = vcmp.lt.s32.totalorder %v1029_v22, %v528_v53 }
 0x121   : > { %vm1495_vm12 = vmor %vm1493_vm0, %vm1494_vm11  ;;  %vm452_vm13 = vcmp.eq.s32.totalorder %v1029_v22, %v434_v52  ;;  %v550_v57 = vsel %vm542_vm9, -1.0, %v856_v31 }
 0x122   : > { %vm507_vm14 = vmor %vm1495_vm12, %vm499_vm6  ;;  %vm358_vm6 = vcmp.eq.s32.totalorder %v1029_v22, %v1101_v58  ;;  %vm422_vm12 = vcmp.eq.s32.totalorder %v1029_v22, %v1153_v14 }
 0x123   : > { %vm476_vm7 = vmor %vm356_vm10, %vm388_vm4  ;;  %v555_v54 = vsel %vm507_vm14, 1.0, %v547_v51  ;;  %vm1496_vm4 = vnez %v1442_v38  ;;  %vm1497_vm10 = vnez %v1454_v1  ;;  %v534_v38 = vpop.permute.xlu0 %533 }
 0x124   : > { %563 = vst [vmem:[%s1294_s5 + $0x8] sm:$0xff] %v555_v54  ;;  %vm484_vm5 = vmor %vm420_vm3, %vm452_vm13  ;;  %v440_v55 = vpop.permute.xlu1 %439  ;;  %vm392_vm3 = vcmp.eq.s32.totalorder %v1029_v22, %v1177_v34  ;;  %vm544_vm9 = vcmp.lt.s32.totalorder %v1029_v22, %v534_v38 }
 0x125   : > { %vm500_vm2 = vmor %vm476_vm7, %vm484_vm5  ;;  %vm454_vm7 = vcmp.eq.s32.totalorder %v1029_v22, %v440_v55  ;;  %v552_v60 = vsel %vm544_vm9, -1.0, %v856_v31  ;;  %vm1509_vm9 = vnez %v1492_v25 }
 0x126   : > { %vm1498_vm0 = vmor %vm1496_vm4, %vm1497_vm10  ;;  %vm1501_vm4 = vnez %v1474_v44  ;;  %vm1502_vm10 = vnez %v1456_v4 }
 0x127   : > { %vm1305_vm11 = vmor %vm1498_vm0, %vm500_vm2  ;;  %vm360_vm2 = vcmp.eq.s32.totalorder %v1029_v22, %v1111_v61 }
 0x128   : > { %vm478_vm14 = vmor %vm358_vm6, %vm390_vm15  ;;  %v446_v58 = vpop.permute.xlu1 %445  ;;  %vm424_vm6 = vcmp.eq.s32.totalorder %v1029_v22, %v1161_v17 }
 0x129   : > { %vm486_vm13 = vmor %vm422_vm12, %vm454_vm7  ;;  %vm456_vm12 = vcmp.eq.s32.totalorder %v1029_v22, %v446_v58 }
 0x12a   : > { %vm502_vm5 = vmor %vm478_vm14, %vm486_vm13  ;;  %vm1504_vm13 = vnez %v1476_v46 }
 0x12b   : > { %vm1503_vm0 = vmor %vm1501_vm4, %vm1502_vm10 }
 0x12c   : > { %vm510_vm15 = vmor %vm1503_vm0, %vm502_vm5  ;;  %vm1505_vm5 = vnez %v1458_v7 }
 0x12d   : > { %vm480_vm8 = vmor %vm360_vm2, %vm392_vm3  ;;  %v558_v59 = vsel %vm510_vm15, 1.0, %v550_v57  ;;  %v516_v62 = vpop.permute.xlu1 %515  ;;  %vm1507_vm2 = vnez %v1472_v32  ;;  %vm1508_vm15 = vnez %v1481_v48 }
 0x12e   : > { %566 = vst [vmem:[%s1294_s5 + $0x20] sm:$0xff] %v558_v59  ;;  %vm488_vm14 = vmor %vm424_vm6, %vm456_vm12  ;;  %vm538_vm3 = vcmp.lt.s32.totalorder %v1029_v22, %v516_v62 }
 0x12f   : > { %vm504_vm7 = vmor %vm480_vm8, %vm488_vm14  ;;  %v546_v63 = vsel %vm538_vm3, -1.0, %v856_v31 }
 0x130   : > { %vm1506_vm4 = vmor %vm1504_vm13, %vm1505_vm5  ;;  %v554_v0 = vsel %vm1507_vm2, 1.0, %v546_v63 }
 0x131   : > { %vm512_vm10 = vmor %vm1506_vm4, %vm504_vm7  ;;  %562 = vst [vmem:[%s1294_s5] sm:$0xff] %v554_v0  ;;  %v522_v1 = vpop.permute.xlu1 %521 }
 0x132   : > { %v560_v61 = vsel %vm512_vm10, 1.0, %v552_v60  ;;  %vm540_vm8 = vcmp.lt.s32.totalorder %v1029_v22, %v522_v1 }
 0x133   : > { %568 = vst [vmem:[%s1294_s5 + $0x30] sm:$0xff] %v560_v61  ;;  %v548_v2 = vsel %vm540_vm8, -1.0, %v856_v31 }
 0x134   : > { %v556_v3 = vsel %vm1305_vm11, 1.0, %v548_v2 }
 0x135   : > { %564 = vst [vmem:[%s1294_s5 + $0x10] sm:$0xff] %v556_v3  ;;  %v525_v4 = vpop.permute.xlu1 %524 }
 0x136   : > { %vm541_vm0 = vcmp.lt.s32.totalorder %v1029_v22, %v525_v4 }
 0x137   : > { %v549_v5 = vsel %vm541_vm0, -1.0, %v856_v31 }
 0x138   : > { %v557_v6 = vsel %vm1508_vm15, 1.0, %v549_v5 }
 0x139   : > { %565 = vst [vmem:[%s1294_s5 + $0x18] sm:$0xff] %v557_v6  ;;  %v531_v7 = vpop.permute.xlu1 %530 }
 0x13a   : > { %vm543_vm6 = vcmp.lt.s32.totalorder %v1029_v22, %v531_v7 }
 0x13b   : > { %v551_v8 = vsel %vm543_vm6, -1.0, %v856_v31 }
 0x13c   : > { %v559_v9 = vsel %vm1255_vm1, 1.0, %v551_v8 }
 0x13d   : > { %567 = vst [vmem:[%s1294_s5 + $0x28] sm:$0xff] %v559_v9  ;;  %v537_v10 = vpop.permute.xlu1 %536 }
 0x13e   : > { %vm545_vm11 = vcmp.lt.s32.totalorder %v1029_v22, %v537_v10 }
 0x13f   : > { %v553_v11 = vsel %vm545_vm11, -1.0, %v856_v31 }
 0x140   : > { %v561_v12 = vsel %vm1509_vm9, 1.0, %v553_v11 }
 0x141   : > { %569 = vst [vmem:[%s1294_s5 + $0x38] sm:$0xff] %v561_v12 }
 0x142   : > { %781 = shalt.err (!%p778_p5)
}
 0x143   : > { %s782_s25 = scalar_lea.hbm %s1360_s16, 1024  ;;  %s786_s28 = scalar_lea.hbm %s1418_s2, 2048 }
 0x144   : > { %p783_p6 = scmp.ne.s32.totalorder %s1360_s16, %s782_s25  ;;  %p787_p10 = scmp.lt.u32.totalorder %s1360_s16, %s1418_s2 }
 0x145   : > { %p788_p11 = scmp.lt.u32.totalorder %s786_s28, %s782_s25  ;;  %p790_p13 = scmp.lt.u32.totalorder %s782_s25, %s1360_s16 }
 0x146   : > { %p784_p7 = pnand %p783_p6, %p915_p4 }
 0x147   : > { %p789_p12 = por %p788_p11, %p787_p10 }
 0x148   : > { %p785_p9 = pneg %p784_p7 }
 0x149   : > { %p791_p0 = por %p790_p13, %p789_p12 }
 0x14b   : > { %p792_p1 = pnand %p791_p0, %p785_p9 }
 0x14d   : > { %795 = shalt.err (!%p792_p1)
}
 0x14e   : > { %s858_s3 = smov 128   ;;  %s859_s4 = smov 8  }
 0x14f   : > { %685 = dma.vmem_to_hbm [thread:$0]  (%p915_p4), %s1362_s7, 1024, %s1360_s16, %s1370_s12, %s858_s3, %s858_s3, %s859_s4  }
 0x150 PF: > { %p691_p2 = scmp.ge.s32.totalorder %s846_s14, 2  ;;  %s600_s5 = sand.u32 1, %s826_s9  }
 0x151   : > { %s601_s6 = scalar_lea.sflag [#allocation3], %s600_s5 }
 0x152   : > { %p688_p3 = pnand %p691_p2, %p922_p8 }
 0x154   : > { %821 = dma.done.wait (!%p688_p3), %s601_s6, 1024  }
 0x155   : > { %823 = vsyncadd (!%p688_p3), %s601_s6, 4294966272  ;;  %s15_s14 = sadd.s32 1, %s846_s14   ;;  %s1510_s9 = smov %s830_s10 }
 0x156   : > { %p12_p5 = scmp.ge.s32.totalorder %s15_s14, 4   ;;  %s1511_s10 = smov %s834_s11 }
 0x157   : > { %s1512_s11 = smov %s928_s22  ;;  %s1513_s12 = smov %s842_s13 }
 0x158   : > { %s1514_s13 = smov %s1516_s17  ;;  %14 = sbr.rel (!%p12_p5) target bundleno = 4 (0x4), region = 66 }
 0x15f   :  { %606 = vsyncpa [#allocation3], 1 }
 0x160   :  { %608 = vsyncpa [#allocation3 + $0x1], 1 }

</bundles_post_ra>
